<compile_context>
chip_gen: v7x
topology: tpu7x:2x2x1
jax: 0.10.0
libtpu: 0.0.40
codegen_flags: <defaults>
</compile_context>

<pallas_src>
import jax
import jax.numpy as jnp
from jax import lax
from jax.experimental import pallas as pl
from jax.experimental.pallas import tpu as pltpu


def _attention_block_kernel(x_ref, phit_ref, g_ref,
                            wx_ref, bx_ref, ww_ref, bw_ref,
                            z_ref,
                            theta_s, m_s, l_s, acc_s):
    """One (batch, q-tile, kv-tile) grid step.

    x_ref    : (1, C, TQ)   query tile of x (channels-first, lane-dense)
    phit_ref : (1, TK, Ci)  key tile  phi(y)^T  (precomputed in wrapper, bf16)
    g_ref    : (1, Ci, TK)  value tile g(y)     (precomputed in wrapper, bf16)
    wx/bx    : (Ci, C) / (Ci, 1)   down_x 1x1 conv
    ww/bw    : (C, Ci) / (C, 1)    BN-folded output 1x1 conv
    z_ref    : (1, C, TQ)
    theta_s  : (Ci, TQ) scratch — theta computed once per query tile
    m_s, l_s : (1, TQ) f32 online-softmax running max / denominator
    acc_s    : (Ci, TQ) f32 attention-output accumulator
    """
    k_step = pl.program_id(2)

    @pl.when(k_step == 0)
    def _init():
        # theta = down_x(x): computed ONCE per query tile, not per KV tile.
        theta = (jnp.dot(wx_ref[...], x_ref[0],
                         preferred_element_type=jnp.float32) + bx_ref[...])
        theta_s[...] = theta.astype(theta_s.dtype)
        m_s[...] = jnp.full(m_s.shape, -jnp.inf, m_s.dtype)
        l_s[...] = jnp.zeros(l_s.shape, l_s.dtype)
        acc_s[...] = jnp.zeros(acc_s.shape, acc_s.dtype)

    # Transposed score tile: keys on the sublane axis, queries on lanes.
    # Plain NN matmul (no transposed operands -> no XLU transpose).
    f_t = jnp.dot(phit_ref[0], theta_s[...],
                  preferred_element_type=jnp.float32)                # (TK, TQ)

    # Online (flash-style) softmax over the key axis (axis 0, sublanes).
    m_prev = m_s[...]                                                # (1, TQ)
    m_new = jnp.maximum(m_prev, jnp.max(f_t, axis=0, keepdims=True))
    alpha = jnp.exp(m_prev - m_new)                                  # (1, TQ)
    p = jnp.exp(f_t - m_new)                                         # (TK, TQ) f32
    l_s[...] = alpha * l_s[...] + jnp.sum(p, axis=0, keepdims=True)
    # acc += g @ p : NN matmul, bf16 operands, f32 accumulate.
    acc_s[...] = alpha * acc_s[...] + jnp.dot(
        g_ref[0], p.astype(g_ref.dtype),
        preferred_element_type=jnp.float32)                          # (Ci, TQ)
    m_s[...] = m_new

    @pl.when(k_step == pl.num_programs(2) - 1)
    def _finalize():
        y2t = acc_s[...] * pl.reciprocal(l_s[...], approx=True)      # (Ci, TQ)
        z = (jnp.dot(ww_ref[...], y2t, preferred_element_type=jnp.float32)
             + bw_ref[...] + x_ref[0].astype(jnp.float32))           # (C, TQ)
        z_ref[0] = z.astype(z_ref.dtype)


def _pick_tile(n, requested, cap=512):
    """Lane-aligned tile size dividing n; fall back to full extent."""
    if requested is not None:
        if requested <= n and n % requested == 0 and requested % 128 == 0:
            return requested
        return n
    t = cap
    while t >= 128:
        if n % t == 0:
            return t
        t -= 128
    return n


def attention_block_forward(x, y, params, *, bn_layer=True, eps=1e-5,
                            tq=None, tk=None, compute_dtype=jnp.bfloat16):
    """Equivalent of AttentionBlock(in_channels=C).forward(x, y) (eval mode).

    Args:
      x, y: (B, C, H, W) arrays.
      params: dict with w_g/b_g, w_x/b_x, w_p/b_p (Ci,C)/(Ci,), w_w/b_w (C,Ci)/(C,),
              and (if bn_layer) bn_gamma, bn_beta, bn_mean, bn_var (C,).
      compute_dtype: dtype for the big MXU matmul operands (bf16 by default,
              f32 accumulation either way).
    Returns:
      z: (B, C, H, W)
    """
    B, C, H, W = x.shape
    N = H * W
    Ci = params["w_g"].shape[0]

    # ---- Fold eval-mode BatchNorm2d into the output 1x1 conv. ----
    # TODO(synk): training-mode BatchNorm (batch statistics) is not implemented;
    # this matches the module's inference forward with running stats.
    w_w, b_w = params["w_w"], params["b_w"]
    if bn_layer:
        inv_std = lax.rsqrt(params["bn_var"] + eps)
        gamma_eff = params["bn_gamma"] * inv_std                    # (C,)
        w_eff = w_w * gamma_eff[:, None]                            # (C, Ci)
        b_eff = (b_w - params["bn_mean"]) * gamma_eff + params["bn_beta"]
    else:
        w_eff, b_eff = w_w, b_w

    # Channels-first, spatial flattened to the last (lane) dim (pure reshape).
    xr = x.reshape(B, C, N)
    yr = y.reshape(B, C, N)

    # ---- Hoist phi(y) and g(y): computed ONCE per batch with plain XLA matmuls
    # instead of once per (q, k) grid step inside the kernel.  phi is stored
    # pre-transposed (N, Ci) so all in-kernel matmuls are NN-oriented, and both
    # are cast to the MXU-native compute dtype to halve HBM/VMEM traffic.
    phi = jnp.einsum("oc,bcn->bon", params["w_p"], yr) + params["b_p"][None, :, None]
    phi_t = jnp.transpose(phi, (0, 2, 1)).astype(compute_dtype)     # (B, N, Ci)
    g = (jnp.einsum("oc,bcn->bon", params["w_g"], yr)
         + params["b_g"][None, :, None]).astype(compute_dtype)      # (B, Ci, N)

    TQ = _pick_tile(N, tq)
    TK = _pick_tile(N, tk)
    grid = (B, N // TQ, N // TK)

    # ---- VMEM budget scaled from the actual (double-buffered) blocks, clamped
    # above the 16/32 MiB scoped defaults but <= 48 MiB for v7x (64 MiB) headroom.
    isz = jnp.dtype(compute_dtype).itemsize
    blk_bytes = (2 * (C * TQ * 4) * 2                        # x tile + out tile (dbl-buf)
                 + 2 * (TK * max(Ci, 128) * isz)             # phi_t tile (lane-padded)
                 + 2 * (max(Ci, 8) * TK * isz)               # g tile
                 + 2 * (Ci * C + C * Ci + Ci + C) * 4        # weights / biases
                 + (2 * Ci * TQ + 2 * TQ) * 4                # scratch (theta/m/l/acc)
                 + TK * TQ * 4)                              # live f_t / p tile
    vmem_limit = int(min(max(2 * blk_bytes, 32 * 1024 * 1024), 48 * 1024 * 1024))

    def bias2d(b):  # (K,) -> (K, 1): broadcasts over the lane axis in-kernel
        return b.reshape(-1, 1)

    out = pl.pallas_call(
        _attention_block_kernel,
        out_shape=jax.ShapeDtypeStruct((B, C, N), x.dtype),
        grid=grid,
        in_specs=[
            pl.BlockSpec((1, C, TQ),  lambda b, q, k: (b, 0, q)),   # x query tile
            pl.BlockSpec((1, TK, Ci), lambda b, q, k: (b, k, 0)),   # phi(y)^T key tile
            pl.BlockSpec((1, Ci, TK), lambda b, q, k: (b, 0, k)),   # g(y) value tile
            pl.BlockSpec((Ci, C),     lambda b, q, k: (0, 0)),      # w_x
            pl.BlockSpec((Ci, 1),     lambda b, q, k: (0, 0)),      # b_x
            pl.BlockSpec((C, Ci),     lambda b, q, k: (0, 0)),      # w_eff (BN folded)
            pl.BlockSpec((C, 1),      lambda b, q, k: (0, 0)),      # b_eff
        ],
        out_specs=pl.BlockSpec((1, C, TQ), lambda b, q, k: (b, 0, q)),
        scratch_shapes=[
            pltpu.VMEM((Ci, TQ), compute_dtype),   # theta (per query tile)
            pltpu.VMEM((1, TQ), jnp.float32),      # m (running max)
            pltpu.VMEM((1, TQ), jnp.float32),      # l (running denom)
            pltpu.VMEM((Ci, TQ), jnp.float32),     # acc
        ],
        compiler_params=pltpu.CompilerParams(
            dimension_semantics=("parallel", "parallel", "arbitrary"),
            vmem_limit_bytes=vmem_limit,
        ),
    )(xr, phi_t, g,
      params["w_x"], bias2d(params["b_x"]),
      w_eff, bias2d(b_eff))

    return out.reshape(B, C, H, W)


def _reference(x, y, params, *, bn_layer=True, eps=1e-5):
    """Pure-JAX mirror of AttentionBlock.forward (eval-mode BN), all f32."""
    B, C, H, W = x.shape
    N = H * W

    def conv1x1(t, w, b):
        return jnp.einsum("oc,bcn->bon", w, t.reshape(B, -1, N)) + b[None, :, None]

    g_y = jnp.transpose(conv1x1(y, params["w_g"], params["b_g"]), (0, 2, 1))      # (B, N, Ci)
    theta_x = jnp.transpose(conv1x1(x, params["w_x"], params["b_x"]), (0, 2, 1))  # (B, N, Ci)
    phi_y = conv1x1(y, params["w_p"], params["b_p"])                              # (B, Ci, N)
    f = jnp.einsum("bqc,bck->bqk", theta_x, phi_y)
    p = jax.nn.softmax(f, axis=-1)
    y2 = jnp.einsum("bqk,bkc->bqc", p, g_y)                                       # (B, N, Ci)
    y2 = jnp.transpose(y2, (0, 2, 1))                                             # (B, Ci, N)
    wy2 = jnp.einsum("oc,bcn->bon", params["w_w"], y2) + params["b_w"][None, :, None]
    if bn_layer:
        inv_std = 1.0 / jnp.sqrt(params["bn_var"] + eps)
        wy2 = ((wy2 - params["bn_mean"][None, :, None]) * inv_std[None, :, None]
               * params["bn_gamma"][None, :, None] + params["bn_beta"][None, :, None])
    return wy2.reshape(B, C, H, W) + x


if __name__ == "__main__":
    # Small shapes consistent with the module: (B, C, H, W) = (2, 4, 16, 16).
    B, C, H, W = 2, 4, 16, 16
    Ci = max(C // 2, 1)

    key = jax.random.PRNGKey(0)
    ks = jax.random.split(key, 12)
    x = jax.random.normal(ks[0], (B, C, H, W), jnp.float32)
    y = jax.random.normal(ks[1], (B, C, H, W), jnp.float32)

    # NOTE: the PyTorch module initializes the BN gamma/beta (or the plain W
    # conv) to zero, making the block an identity at init.  Random non-zero
    # parameters are used here so the kernel math is actually exercised.
    params = dict(
        w_g=jax.random.normal(ks[2], (Ci, C), jnp.float32) * 0.5,
        b_g=jax.random.normal(ks[3], (Ci,), jnp.float32) * 0.1,
        w_x=jax.random.normal(ks[4], (Ci, C), jnp.float32) * 0.5,
        b_x=jax.random.normal(ks[5], (Ci,), jnp.float32) * 0.1,
        w_p=jax.random.normal(ks[6], (Ci, C), jnp.float32) * 0.5,
        b_p=jax.random.normal(ks[7], (Ci,), jnp.float32) * 0.1,
        w_w=jax.random.normal(ks[8], (C, Ci), jnp.float32) * 0.5,
        b_w=jax.random.normal(ks[9], (C,), jnp.float32) * 0.1,
        bn_gamma=jax.random.normal(ks[10], (C,), jnp.float32) * 0.5 + 1.0,
        bn_beta=jax.random.normal(ks[11], (C,), jnp.float32) * 0.1,
        bn_mean=jnp.zeros((C,), jnp.float32),
        bn_var=jnp.ones((C,), jnp.float32),
    )

    z_ref = _reference(x, y, params, bn_layer=True)

    # tq=tk=128 with N=256 exercises both the query-tile grid axis and the
    # online-softmax KV-tile axis (2 x 2 tiles per batch element).
    z = attention_block_forward(x, y, params, bn_layer=True, tq=128, tk=128)
    jax.block_until_ready(z)
    assert z.shape == (B, C, H, W)
    err_bf16 = float(jnp.max(jnp.abs(z - z_ref)))
    # bf16 MXU operands -> flash-attention-level rounding vs the f32 reference.
    assert err_bf16 < 5e-2, err_bf16

    # Strict-parity run with f32 matmul operands (same kernel, same tiling).
    z32 = attention_block_forward(x, y, params, bn_layer=True, tq=128, tk=128,
                                  compute_dtype=jnp.float32)
    jax.block_until_ready(z32)
    err_f32 = float(jnp.max(jnp.abs(z32 - z_ref)))
    assert jnp.allclose(z32, z_ref, atol=3e-3, rtol=3e-3), err_f32

    print("KERNEL_OK")
</pallas_src>

<mosaic_0001>
module attributes {stable_mosaic.version = 11 : i64} {
  func.func @_attention_block_kernel(%arg0: i32, %arg1: i32, %arg2: i32, %arg3: memref<1x4x128xf32, #tpu.memory_space<vmem>>, %arg4: memref<1x128x2xbf16, #tpu.memory_space<vmem>>, %arg5: memref<1x2x128xbf16, #tpu.memory_space<vmem>>, %arg6: memref<2x4xf32, #tpu.memory_space<vmem>>, %arg7: memref<2x1xf32, #tpu.memory_space<vmem>>, %arg8: memref<4x2xf32, #tpu.memory_space<vmem>>, %arg9: memref<4x1xf32, #tpu.memory_space<vmem>>, %arg10: memref<1x4x128xf32, #tpu.memory_space<vmem>>, %arg11: memref<2x128xbf16, #tpu.memory_space<vmem>>, %arg12: memref<1x128xf32, #tpu.memory_space<vmem>>, %arg13: memref<1x128xf32, #tpu.memory_space<vmem>>, %arg14: memref<2x128xf32, #tpu.memory_space<vmem>>) attributes {dimension_semantics = [#tpu.dimension_semantics<parallel>, #tpu.dimension_semantics<parallel>, #tpu.dimension_semantics<arbitrary>], iteration_bounds = array<i64: 2, 2, 2>, scalar_prefetch = 0 : i64, scratch_operands = 4 : i64, tpu.core_type = #tpu.core_type<tc>, window_params = [{transform_indices = @transform_0, window_bounds = array<i64: 1, 4, 128>}, {transform_indices = @transform_1, window_bounds = array<i64: 1, 128, 2>}, {transform_indices = @transform_2, window_bounds = array<i64: 1, 2, 128>}, {pipeline_mode = #tpu.pipeline_mode<synchronous>, transform_indices = @transform_3, window_bounds = array<i64: 2, 4>}, {pipeline_mode = #tpu.pipeline_mode<synchronous>, transform_indices = @transform_4, window_bounds = array<i64: 2, 1>}, {pipeline_mode = #tpu.pipeline_mode<synchronous>, transform_indices = @transform_5, window_bounds = array<i64: 4, 2>}, {pipeline_mode = #tpu.pipeline_mode<synchronous>, transform_indices = @transform_6, window_bounds = array<i64: 4, 1>}, {transform_indices = @transform_7, window_bounds = array<i64: 1, 4, 128>}]} {
    %c0_i32 = arith.constant 0 : i32
    %0 = arith.cmpi eq, %arg2, %c0_i32 : i32
    %1 = arith.extui %0 : i1 to i32
    %c0_i32_0 = arith.constant 0 : i32
    %2 = arith.cmpi ne, %1, %c0_i32_0 : i32
    scf.if %2 {
      %c0_24 = arith.constant 0 : index
      %c0_25 = arith.constant 0 : index
      %35 = vector.load %arg6[%c0_24, %c0_25] : memref<2x4xf32, #tpu.memory_space<vmem>>, vector<2x4xf32>
      %c0_26 = arith.constant 0 : index
      %c0_27 = arith.constant 0 : index
      %c0_28 = arith.constant 0 : index
      %36 = vector.load %arg3[%c0_26, %c0_27, %c0_28] : memref<1x4x128xf32, #tpu.memory_space<vmem>>, vector<1x4x128xf32>
      %37 = vector.shape_cast %36 : vector<1x4x128xf32> to vector<4x128xf32>
      %cst_29 = arith.constant dense<0.000000e+00> : vector<2x128xf32>
      %38 = tpu.matmul %35, %37, %cst_29 {dimension_numbers = #tpu.dot_dimension_numbers<[1], [0], [0], [1], [0, 0, 1, 1], [], []>} : vector<2x4xf32>, vector<4x128xf32>, vector<2x128xf32> -> vector<2x128xf32>
      %c0_30 = arith.constant 0 : index
      %c0_31 = arith.constant 0 : index
      %39 = vector.load %arg7[%c0_30, %c0_31] : memref<2x1xf32, #tpu.memory_space<vmem>>, vector<2x1xf32>
      %40 = vector.broadcast %39 : vector<2x1xf32> to vector<2x128xf32>
      %41 = arith.addf %38, %40 : vector<2x128xf32>
      %42 = arith.truncf %41 : vector<2x128xf32> to vector<2x128xbf16>
      %c0_32 = arith.constant 0 : index
      %c0_33 = arith.constant 0 : index
      %43 = vector.load %arg11[%c0_32, %c0_33] : memref<2x128xbf16, #tpu.memory_space<vmem>>, vector<2x128xbf16>
      tpu.vector_store %arg11[%c0_32, %c0_33], %42 {strides = array<i32>} : memref<2x128xbf16, #tpu.memory_space<vmem>>, vector<2x128xbf16>,
      %cst_34 = arith.constant 0xFF800000 : f32
      %44 = vector.broadcast %cst_34 : f32 to vector<1x128xf32>
      %c0_35 = arith.constant 0 : index
      %c0_36 = arith.constant 0 : index
      %45 = vector.load %arg12[%c0_35, %c0_36] : memref<1x128xf32, #tpu.memory_space<vmem>>, vector<1x128xf32>
      tpu.vector_store %arg12[%c0_35, %c0_36], %44 {strides = array<i32>} : memref<1x128xf32, #tpu.memory_space<vmem>>, vector<1x128xf32>,
      %cst_37 = arith.constant 0.000000e+00 : f32
      %46 = vector.broadcast %cst_37 : f32 to vector<1x128xf32>
      %c0_38 = arith.constant 0 : index
      %c0_39 = arith.constant 0 : index
      %47 = vector.load %arg13[%c0_38, %c0_39] : memref<1x128xf32, #tpu.memory_space<vmem>>, vector<1x128xf32>
      tpu.vector_store %arg13[%c0_38, %c0_39], %46 {strides = array<i32>} : memref<1x128xf32, #tpu.memory_space<vmem>>, vector<1x128xf32>,
      %cst_40 = arith.constant 0.000000e+00 : f32
      %48 = vector.broadcast %cst_40 : f32 to vector<2x128xf32>
      %c0_41 = arith.constant 0 : index
      %c0_42 = arith.constant 0 : index
      %49 = vector.load %arg14[%c0_41, %c0_42] : memref<2x128xf32, #tpu.memory_space<vmem>>, vector<2x128xf32>
      tpu.vector_store %arg14[%c0_41, %c0_42], %48 {strides = array<i32>} : memref<2x128xf32, #tpu.memory_space<vmem>>, vector<2x128xf32>,
    } else {
    }
    %c0 = arith.constant 0 : index
    %c0_1 = arith.constant 0 : index
    %c0_2 = arith.constant 0 : index
    %3 = vector.load %arg4[%c0, %c0_1, %c0_2] : memref<1x128x2xbf16, #tpu.memory_space<vmem>>, vector<1x128x2xbf16>
    %4 = vector.shape_cast %3 : vector<1x128x2xbf16> to vector<128x2xbf16>
    %c0_3 = arith.constant 0 : index
    %c0_4 = arith.constant 0 : index
    %5 = vector.load %arg11[%c0_3, %c0_4] : memref<2x128xbf16, #tpu.memory_space<vmem>>, vector<2x128xbf16>
    %cst = arith.constant dense<0.000000e+00> : vector<128x128xf32>
    %6 = tpu.matmul %4, %5, %cst {dimension_numbers = #tpu.dot_dimension_numbers<[1], [0], [0], [1], [0, 0, 1, 1], [], []>} : vector<128x2xbf16>, vector<2x128xbf16>, vector<128x128xf32> -> vector<128x128xf32>
    %c0_5 = arith.constant 0 : index
    %c0_6 = arith.constant 0 : index
    %7 = vector.load %arg12[%c0_5, %c0_6] : memref<1x128xf32, #tpu.memory_space<vmem>>, vector<1x128xf32>
    %cst_7 = arith.constant dense<0xFF800000> : vector<128xf32>
    %8 = vector.multi_reduction <maximumf>, %6, %cst_7 [0] : vector<128x128xf32> to vector<128xf32>
    %9 = vector.shape_cast %8 : vector<128xf32> to vector<1x128xf32>
    %10 = arith.maximumf %7, %9 : vector<1x128xf32>
    %11 = arith.subf %7, %10 : vector<1x128xf32>
    %12 = math.exp %11 : vector<1x128xf32>
    %13 = vector.broadcast %10 : vector<1x128xf32> to vector<128x128xf32>
    %14 = arith.subf %6, %13 : vector<128x128xf32>
    %15 = math.exp %14 : vector<128x128xf32>
    %c0_8 = arith.constant 0 : index
    %c0_9 = arith.constant 0 : index
    %16 = vector.load %arg13[%c0_8, %c0_9] : memref<1x128xf32, #tpu.memory_space<vmem>>, vector<1x128xf32>
    %17 = arith.mulf %12, %16 : vector<1x128xf32>
    %cst_10 = arith.constant dense<0.000000e+00> : vector<128xf32>
    %18 = vector.multi_reduction <add>, %15, %cst_10 [0] : vector<128x128xf32> to vector<128xf32>
    %19 = vector.shape_cast %18 : vector<128xf32> to vector<1x128xf32>
    %20 = arith.addf %17, %19 : vector<1x128xf32>
    %c0_11 = arith.constant 0 : index
    %c0_12 = arith.constant 0 : index
    %21 = vector.load %arg13[%c0_11, %c0_12] : memref<1x128xf32, #tpu.memory_space<vmem>>, vector<1x128xf32>
    tpu.vector_store %arg13[%c0_11, %c0_12], %20 {strides = array<i32>} : memref<1x128xf32, #tpu.memory_space<vmem>>, vector<1x128xf32>,
    %c0_13 = arith.constant 0 : index
    %c0_14 = arith.constant 0 : index
    %22 = vector.load %arg14[%c0_13, %c0_14] : memref<2x128xf32, #tpu.memory_space<vmem>>, vector<2x128xf32>
    %23 = vector.broadcast %12 : vector<1x128xf32> to vector<2x128xf32>
    %24 = arith.mulf %23, %22 : vector<2x128xf32>
    %c0_15 = arith.constant 0 : index
    %c0_16 = arith.constant 0 : index
    %c0_17 = arith.constant 0 : index
    %25 = vector.load %arg5[%c0_15, %c0_16, %c0_17] : memref<1x2x128xbf16, #tpu.memory_space<vmem>>, vector<1x2x128xbf16>
    %26 = vector.shape_cast %25 : vector<1x2x128xbf16> to vector<2x128xbf16>
    %27 = arith.truncf %15 : vector<128x128xf32> to vector<128x128xbf16>
    %cst_18 = arith.constant dense<0.000000e+00> : vector<2x128xf32>
    %28 = tpu.matmul %26, %27, %cst_18 {dimension_numbers = #tpu.dot_dimension_numbers<[1], [0], [0], [1], [0, 0, 1, 1], [], []>} : vector<2x128xbf16>, vector<128x128xbf16>, vector<2x128xf32> -> vector<2x128xf32>
    %29 = arith.addf %24, %28 : vector<2x128xf32>
    %c0_19 = arith.constant 0 : index
    %c0_20 = arith.constant 0 : index
    %30 = vector.load %arg14[%c0_19, %c0_20] : memref<2x128xf32, #tpu.memory_space<vmem>>, vector<2x128xf32>
    tpu.vector_store %arg14[%c0_19, %c0_20], %29 {strides = array<i32>} : memref<2x128xf32, #tpu.memory_space<vmem>>, vector<2x128xf32>,
    %c0_21 = arith.constant 0 : index
    %c0_22 = arith.constant 0 : index
    %31 = vector.load %arg12[%c0_21, %c0_22] : memref<1x128xf32, #tpu.memory_space<vmem>>, vector<1x128xf32>
    tpu.vector_store %arg12[%c0_21, %c0_22], %10 {strides = array<i32>} : memref<1x128xf32, #tpu.memory_space<vmem>>, vector<1x128xf32>,
    %c1_i32 = arith.constant 1 : i32
    %32 = arith.cmpi eq, %arg2, %c1_i32 : i32
    %33 = arith.extui %32 : i1 to i32
    %c0_i32_23 = arith.constant 0 : i32
    %34 = arith.cmpi ne, %33, %c0_i32_23 : i32
    scf.if %34 {
      %c0_24 = arith.constant 0 : index
      %c0_25 = arith.constant 0 : index
      %35 = vector.load %arg14[%c0_24, %c0_25] : memref<2x128xf32, #tpu.memory_space<vmem>>, vector<2x128xf32>
      %c0_26 = arith.constant 0 : index
      %c0_27 = arith.constant 0 : index
      %36 = vector.load %arg13[%c0_26, %c0_27] : memref<1x128xf32, #tpu.memory_space<vmem>>, vector<1x128xf32>
      %37 = tpu.reciprocal %36 {approx = true} : vector<1x128xf32> -> vector<1x128xf32>
      %38 = vector.broadcast %37 : vector<1x128xf32> to vector<2x128xf32>
      %39 = arith.mulf %35, %38 : vector<2x128xf32>
      %c0_28 = arith.constant 0 : index
      %c0_29 = arith.constant 0 : index
      %40 = vector.load %arg8[%c0_28, %c0_29] : memref<4x2xf32, #tpu.memory_space<vmem>>, vector<4x2xf32>
      %cst_30 = arith.constant dense<0.000000e+00> : vector<4x128xf32>
      %41 = tpu.matmul %40, %39, %cst_30 {dimension_numbers = #tpu.dot_dimension_numbers<[1], [0], [0], [1], [0, 0, 1, 1], [], []>} : vector<4x2xf32>, vector<2x128xf32>, vector<4x128xf32> -> vector<4x128xf32>
      %c0_31 = arith.constant 0 : index
      %c0_32 = arith.constant 0 : index
      %42 = vector.load %arg9[%c0_31, %c0_32] : memref<4x1xf32, #tpu.memory_space<vmem>>, vector<4x1xf32>
      %43 = vector.broadcast %42 : vector<4x1xf32> to vector<4x128xf32>
      %44 = arith.addf %41, %43 : vector<4x128xf32>
      %c0_33 = arith.constant 0 : index
      %c0_34 = arith.constant 0 : index
      %c0_35 = arith.constant 0 : index
      %45 = vector.load %arg3[%c0_33, %c0_34, %c0_35] : memref<1x4x128xf32, #tpu.memory_space<vmem>>, vector<1x4x128xf32>
      %46 = vector.shape_cast %45 : vector<1x4x128xf32> to vector<4x128xf32>
      %47 = arith.addf %44, %46 : vector<4x128xf32>
      %c0_36 = arith.constant 0 : index
      %c0_37 = arith.constant 0 : index
      %c0_38 = arith.constant 0 : index
      %48 = vector.load %arg10[%c0_36, %c0_37, %c0_38] : memref<1x4x128xf32, #tpu.memory_space<vmem>>, vector<1x4x128xf32>
      %49 = vector.shape_cast %48 : vector<1x4x128xf32> to vector<4x128xf32>
      %50 = vector.shape_cast %47 : vector<4x128xf32> to vector<1x4x128xf32>
      tpu.vector_store %arg10[%c0_36, %c0_37, %c0_38], %50 {strides = array<i32>} : memref<1x4x128xf32, #tpu.memory_space<vmem>>, vector<1x4x128xf32>,
    } else {
    }
    return
  }
  func.func @transform_0(%arg0: i32, %arg1: i32, %arg2: i32) -> (i32, i32, i32) {
    %c0_i32 = arith.constant 0 : i32
    %c0_i32_0 = arith.constant 0 : i32
    return %arg0, %c0_i32, %arg1 : i32, i32, i32
  }
  func.func @transform_1(%arg0: i32, %arg1: i32, %arg2: i32) -> (i32, i32, i32) {
    %c0_i32 = arith.constant 0 : i32
    %c0_i32_0 = arith.constant 0 : i32
    return %arg0, %arg2, %c0_i32 : i32, i32, i32
  }
  func.func @transform_2(%arg0: i32, %arg1: i32, %arg2: i32) -> (i32, i32, i32) {
    %c0_i32 = arith.constant 0 : i32
    %c0_i32_0 = arith.constant 0 : i32
    return %arg0, %c0_i32, %arg2 : i32, i32, i32
  }
  func.func @transform_3(%arg0: i32, %arg1: i32, %arg2: i32) -> (i32, i32) {
    %c0_i32 = arith.constant 0 : i32
    %c0_i32_0 = arith.constant 0 : i32
    %c0_i32_1 = arith.constant 0 : i32
    return %c0_i32, %c0_i32_0 : i32, i32
  }
  func.func @transform_4(%arg0: i32, %arg1: i32, %arg2: i32) -> (i32, i32) {
    %c0_i32 = arith.constant 0 : i32
    %c0_i32_0 = arith.constant 0 : i32
    %c0_i32_1 = arith.constant 0 : i32
    return %c0_i32, %c0_i32_0 : i32, i32
  }
  func.func @transform_5(%arg0: i32, %arg1: i32, %arg2: i32) -> (i32, i32) {
    %c0_i32 = arith.constant 0 : i32
    %c0_i32_0 = arith.constant 0 : i32
    %c0_i32_1 = arith.constant 0 : i32
    return %c0_i32, %c0_i32_0 : i32, i32
  }
  func.func @transform_6(%arg0: i32, %arg1: i32, %arg2: i32) -> (i32, i32) {
    %c0_i32 = arith.constant 0 : i32
    %c0_i32_0 = arith.constant 0 : i32
    %c0_i32_1 = arith.constant 0 : i32
    return %c0_i32, %c0_i32_0 : i32, i32
  }
  func.func @transform_7(%arg0: i32, %arg1: i32, %arg2: i32) -> (i32, i32, i32) {
    %c0_i32 = arith.constant 0 : i32
    %c0_i32_0 = arith.constant 0 : i32
    return %arg0, %c0_i32, %arg1 : i32, i32, i32
  }
}

</mosaic_0001>

<bundles_post_ra>
// kernel: tpu_custom_call.1
= control target key start
LH: loop header
LB: loop body
LE: loop exit
PB: predicated region body
PF: predicated region fallthrough
CT: control target
= control target key end

     0   :  { %s1718_s0 = inlined_call_operand.vmem [shape: f32[2,4,256], index: 0, kind: input, shape index: {}]   ;;  %s1719_s1 = inlined_call_operand.vmem [shape: bf16[2,256,2], index: 1, kind: input, shape index: {}]   ;;  %s1720_s2 = inlined_call_operand.vmem [shape: bf16[2,2,256], index: 2, kind: input, shape index: {}]   ;;  %s1721_s3 = inlined_call_operand.vmem [shape: f32[2,4], index: 3, kind: input, shape index: {}]   ;;  %s1722_s4 = inlined_call_operand.vmem [shape: f32[2,1], index: 4, kind: input, shape index: {}]   ;;  %s1723_s5 = inlined_call_operand.vmem [shape: f32[4,2], index: 5, kind: input, shape index: {}]   ;;  %s1724_s6 = inlined_call_operand.vmem [shape: f32[4,1], index: 6, kind: input, shape index: {}]   ;;  %s1725_s7 = inlined_call_operand.hbm [shape: f32[2,4,256], index: 7, kind: output, shape index: {}]  }
   0x1   :  { %1738 = sst [smem:[#allocation20_spill]] %s1725_s7 }
   0x2   :  { %12 = vsyncpa [#allocation7], 0 }
   0x3   :  { %14 = vsyncpa [#allocation7 + $0x1], 0  ;;  %s1465_s24 = smov 0   ;;  %s1467_s25 = smov 0  }
   0x4   :  { %s1469_s26 = smov 0   ;;  %s1471_s27 = smov 0  }
   0x5   :  { %s1473_s28 = smov 0   ;;  %s1475_s29 = smov 0  }
   0x6   :  { %s1477_s30 = smov 0   ;;  %s1479_s8 = smov 0  }
   0x7   :  { %s1481_s9 = smov 0   ;;  %s1483_s10 = smov 0  }
   0x8 LB: > { %1739 = sst [smem:[#allocation9_spill]] %s1377_s24  ;;  %s1051_s11 = sadd.s32 4294967295, %s1413_s10   ;;  %s1413_s10 = sphi %s1483_s10, %s20_s10   ;;  %s1409_s9 = sphi %s1481_s9, %s1764_s9   ;;  %s1405_s8 = sphi %s1479_s8, %s1763_s8   ;;  %s1401_s30 = sphi %s1477_s30, %s1762_s30   ;;  %s1397_s29 = sphi %s1475_s29, %s1761_s29   ;;  %s1393_s28 = sphi %s1473_s28, %s1760_s28   ;;  %s1389_s27 = sphi %s1471_s27, %s1759_s27   ;;  %s1385_s26 = sphi %s1469_s26, %s1758_s26   ;;  %s1381_s25 = sphi %s1467_s25, %s1766_s25   ;;  %s1377_s24 = sphi %s1465_s24, %s1765_s24  }
   0x9   : > { %1740 = sst [smem:[#allocation10_spill]] %s1385_s26  ;;  %s1052_s12 = sadd.s32 4294967294, %s1413_s10  }
   0xa   : > { %1741 = sst [smem:[#allocation11_spill]] %s1401_s30  ;;  %s32_s13 = sadd.s32 1, %s1401_s30 }
   0xb   : > { %1742 = sst [smem:[#allocation12_spill]] %s1405_s8  ;;  %p33_p0 = scmp.ge.s32.totalorder %s32_s13, 2 }
   0xc   : > { %1743 = sst [smem:[#allocation13_spill]] %s1409_s9  ;;  %s35_s14 = sadd.s32 1, %s1405_s8 }
   0xd   : > { %1744 = sst [smem:[#allocation14_spill]] %s1413_s10  ;;  %s39_s15 = sadd.s32 1, %s1409_s9 }
   0xe   : > { %p226_p1 = scmp.ne.s32.totalorder %s1385_s26, %s1381_s25  ;;  %s1768_s13 = smov (%p33_p0, %s32_s13), 0 }
   0xf   : > { %1745 = sst [smem:[#allocation15_spill]] %s1768_s13  ;;  %s1770_s14 = smov (!%p33_p0, %s35_s14), %s1405_s8 }
  0x10   : > { %p227_p2 = scmp.eq.s32.totalorder %s1051_s11, 7  ;;  %p232_p3 = scmp.ne.s32.totalorder %s1381_s25, %s1377_s24 }
  0x11   : > { %p37_p4 = scmp.ge.s32.totalorder %s1770_s14, 2  ;;  %p233_p5 = scmp.eq.s32.totalorder %s1052_s12, 7 }
  0x12   : > { %p1527_p6 = por %p227_p2, %p226_p1  ;;  %p1055_p8 = scmp.ge.s32.totalorder %s1413_s10, 1 }
  0x13   : > { %s1772_s14 = smov (%p37_p4, %s1770_s14), 0  ;;  %s1774_s15 = smov (!%p37_p4, %s39_s15), %s1409_s9 }
  0x14   : > { %1747 = sst [smem:[#allocation16_spill]] %s1772_s14  ;;  %p1534_p7 = por %p233_p5, %p232_p3 }
  0x15   : > { %p41_p9 = scmp.ge.s32.totalorder %s1774_s15, 2  ;;  %p297_p10 = scmp.lt.s32.totalorder %s1413_s10, 9 }
  0x16   : > { %s1748_s17 = scalar_select %p1534_p7, 1, 0 }
  0x17   : > { %s212_s18 = ssub.s32 %s1405_s8, %s1772_s14  ;;  %s1776_s15 = smov (%p41_p9, %s1774_s15), 0 }
  0x18   : > { %1749 = sst [smem:[#allocation17_spill]] %s1748_s17  ;;  %p298_p11 = pnand %p1055_p8, %p297_p10 }
  0x19   : > { %1750 = sst [smem:[#allocation18_spill]] %s1776_s15  ;;  %s211_s19 = ssub.s32 %s1409_s9, %s1776_s15 }
  0x1a   : > { %s213_s20 = sor.u32 %s212_s18, %s211_s19  ;;  %s216_s21 = sadd.s32 1, %s1385_s26 }
  0x1b   : > { %p214_p12 = scmp.eq.s32.totalorder %s213_s20, 0  ;;  %301 = sbr.rel (%p298_p11) target bundleno = 1051 (0x41b), region = 48 }
  0x1c   : > { %s1731_s23 = sand.u32 (!%p298_p11), 1, %s1381_s25   ;;  %p348_p13 = scmp.lt.s32.totalorder (!%p298_p11), %s1397_s29, 1 }
  0x1d   : > { %s1548_s22 = scalar_select %p214_p12, %s1385_s26, %s216_s21  }
  0x1e   : > { %s1554_s11 = sshll.u32 (!%p298_p11), %s1731_s23, 2  ;;  %p350_p0 = scmp.lt.s32.totalorder (!%p298_p11), %s1393_s28, 1 }
  0x1f   : > { %1751 = sst [smem:[#allocation19_spill]] %s1548_s22  ;;  %s1059_s12 = sshll.u32 (!%p298_p11), %s1389_s27, 4 }
  0x20   : > { %p359_p1 = scmp.lt.s32.totalorder (!%p298_p11), %s1059_s12, 31  ;;  %p368_p2 = scmp.lt.s32.totalorder (!%p298_p11), %s1389_s27, 1 }
  0x21   : > { %s347_s13 = scalar_lea.vmem (!%p298_p11), [#allocation6], %s1554_s11  ;;  %p1063_p3 = scmp.ne.s32.totalorder (!%p298_p11), %s1389_s27, 0 }
  0x22   : > { %s349_s18 = scalar_select %p348_p13, %s1397_s29, 1 }
  0x23   : > { %s351_s19 = scalar_select %p350_p0, %s1393_s28, 1 }
  0x24   : > { %s1057_s20 = sshll.u32 %s349_s18, 1  ;;  %s1060_s8 = sshll.u32 %s349_s18, 5  ;;  %vm390_vm0 = vcmask (!%p1063_p3), 1043456   ;;  %vm386_vm1 = vcmask (!%p1063_p3), 31744   ;;  %v1415_v1 = vmov (!%p1063_p3), 0.0   ;;  %vm1416_vm2 = vmmov (!%p1063_p3), 0  }
  0x25   : > { %s353_s21 = sadd.s32 %s1057_s20, %s351_s19  ;;  %s1778_s12 = smov (!%p359_p1, %s1059_s12), 31  ;;  %1112 = vmatprep.subr.mxu0 (!%p1063_p3), %v1415_v1  ;;  %467 = vst [vmem:[#allocation4] sm:$0x1] (!%p1063_p3), %v1415_v1  ;;  %468 = vst [vmem:[#allocation5] sm:$0x3] (!%p1063_p3), %v1415_v1  ;;  %1114 = vmatprep.mubr.msk.f32.mxu0 (!%p1063_p3), %vm1416_vm2, %v1415_v1  ;;  %v1417_v4 = vmov (!%p1063_p3), 0  }
  0x26   : > { %s1058_s15 = sshll.u32 %s353_s21, 2  ;;  %s362_s23 = sadd.s32 %s1060_s8, %s1778_s12  ;;  %v378_v2 = vld [vmem:[%s1721_s3] sm:$0x3] (!%p1063_p3)  ;;  %1257 = vset.pattern.permute.xlu0 (!%p1063_p3), %v1417_v4  ;;  %v1418_v5 = vmov (!%p1063_p3), -inf  }
  0x27   : > { %s1564_s9 = scalar_lea.vmem %s1718_s0, %s1058_s15  ;;  %s1061_s22 = sshll.u32 %s362_s23, 2  ;;  %v380_v3 = vld [vmem:[%s1722_s4] sm:$0x3] (!%p1063_p3)  ;;  %466 = vst [vmem:[#allocation3] sm:$0x1] (!%p1063_p3), %v1418_v5 }
  0x28   : > { %s369_s30 = scalar_select %p368_p2, %s1389_s27, 1 }
  0x29   : > { %s1572_s10 = scalar_lea.vmem %s1719_s1, %s1061_s22  ;;  %377 = sbr.rel (%p1063_p3) target bundleno = 260 (0x104), region = 52  ;;  %v379_v0 = vld [vmem:[%s1564_s9] sm:$0xf] (!%p1063_p3)  ;;  %383 = vperm.xlu0 (!%p1063_p3), %1257, %v380_v3  }
  0x2a   : > { %s1567_s26 = sadd.s32 %s1057_s20, %s369_s30  ;;  %1113 = vmatpush3.msk.msra.mxu0 (!%p1063_p3), %vm390_vm0, %v379_v0 }
  0x2b   : > { %s372_s7 = scalar_lea.vmem %s1720_s2, %s1567_s26  ;;  %1115 = vmatmul.mubr.msk.f32.vlgmr.msra.gmra.mrb[0].mxu0 (!%p1063_p3), %vm386_vm1, %v378_v2 }
  0xa8   : > { %v384_v6 = vpop.permute.xlu0 %383 }
  0xfe   : > { %v460_v7 = vpop.f32.mrb[0].mxu0 }
  0xff   : > { %v461_v8 = vadd.f32 %v460_v7, %v384_v6  ;;  %v1116_v9 = vpop.f32.mrb[1].mxu0 }
 0x101   : > { %v464_v10 = vpack.c.bf16 %v461_v8, %v461_v8 }
 0x103   : > { %465 = vst [vmem:[#allocation2] sm:$0x1] %v464_v10 }
 0x104 PF: > { %vm551_vm3 = vcmask 1040384   ;;  %v1258_v12 = vld [vmem:[%s1572_s10] sm:$0xff]   ;;  %vm526_vm4 = vcmask 15360   ;;  %v1259_v14 = vld [vmem:[%s1572_s10 + $0x8] sm:$0xff]   ;;  %v1260_v15 = vld [vmem:[%s1572_s10 + $0x10] sm:$0xff]   ;;  %v1419_v21 = vmov 0.0   ;;  %v679_v55 = vlaneseq }
 0x105   : > { %1119 = vmatprep.mubr.msk.bf16.mxu0 %vm526_vm4, %v1258_v12  ;;  %v1261_v16 = vld [vmem:[%s1572_s10 + $0x18] sm:$0xff]   ;;  %v1262_v17 = vld [vmem:[%s1572_s10 + $0x20] sm:$0xff]   ;;  %v1263_v18 = vld [vmem:[%s1572_s10 + $0x28] sm:$0xff]   ;;  %1135 = vmatprep.subr.bf16.mxu1 %v1419_v21  ;;  %vm1420_vm5 = vmmov 0   ;;  %p1082_p4 = scmp.ne.s32.totalorder %s1389_s27, 1 }
 0x106   : > { %v1264_v19 = vld [vmem:[%s1572_s10 + $0x30] sm:$0xff]   ;;  %v1265_v20 = vld [vmem:[%s1572_s10 + $0x38] sm:$0xff]   ;;  %1151 = vmatprep.mubr.msk.bf16.mxu1 %vm1420_vm5, %v1419_v21  ;;  %v680_v58 = vshrl.u32 %v679_v55, 7  ;;  %v652_v60 = vld [vmem:[#allocation3] sm:$0x1]  ;;  %vm1422_vm6 = vmmov (!%p1082_p4), 0  }
 0x107   : > { %vm841_vm7 = vcmask (!%p1082_p4), 1041408  }
 0x108   : > { %v1623_v62 = vsub.s32 0, %v680_v58 }
 0x10a   : > { %v485_v11 = vld [vmem:[#allocation2] sm:$0x1] }
 0x10b   : > { %1160 = vmatprep.subr.msk.bf16.mxu0 %vm551_vm3, %v485_v11  ;;  %v553_v13 = vsel %vm551_vm3, %v485_v11, 0 }
 0x10c   : > { %1118 = vmatpush3.bf16.msra.mxu0 %v553_v13 }
 0x10f   : > { %1120 = vmatmul.mubr.msk.bf16.vlgmr.msra.gmra.mrb[0].mxu0 %vm526_vm4, %v1259_v14 }
 0x110   : > { %1123 = vmatprep.mubr.msk.bf16.mxu0 %vm526_vm4, %v1260_v15 }
 0x117   : > { %1124 = vmatmul.mubr.msk.bf16.gmra.mrb[4].mxu0 %vm526_vm4, %v1261_v16 }
 0x118   : > { %1127 = vmatprep.mubr.msk.bf16.mxu0 %vm526_vm4, %v1262_v17 }
 0x11f   : > { %1128 = vmatmul.mubr.msk.bf16.gmra.mrb[8].mxu0 %vm526_vm4, %v1263_v18 }
 0x120   : > { %1131 = vmatprep.mubr.msk.bf16.mxu0 %vm526_vm4, %v1264_v19 }
 0x127   : > { %1132 = vmatmul.mubr.msk.bf16.gmra.mrb[12].mxu0 %vm526_vm4, %v1265_v20 }
 0x1e2   : > { %v1121_v22 = vpop.f32.mrb[0].mxu0 }
 0x1e3   : > { %v589_v23 = vpop.f32.mrb[1].mxu0 }
 0x1e4   : > { %v1122_v24 = vpop.f32.mrb[2].mxu0 }
 0x1e5   : > { %v592_v25 = vpop.f32.mrb[3].mxu0 }
 0x1ea   : > { %v1605_v26 = vpop.f32.mrb[4].mxu0 }
 0x1eb   : > { %v655_v27 = vmax.f32 %v1121_v22, %v1605_v26  ;;  %v605_v28 = vpop.f32.mrb[5].mxu0 }
 0x1ec   : > { %v653_v29 = vmax.f32 %v589_v23, %v605_v28  ;;  %v1608_v30 = vpop.f32.mrb[6].mxu0 }
 0x1ed   : > { %v656_v31 = vmax.f32 %v1122_v24, %v1608_v30  ;;  %v608_v32 = vpop.f32.mrb[7].mxu0 }
 0x1ee   : > { %v654_v33 = vmax.f32 %v592_v25, %v608_v32 }
 0x1f2   : > { %v1611_v34 = vpop.f32.mrb[8].mxu0 }
 0x1f3   : > { %v659_v35 = vmax.f32 %v655_v27, %v1611_v34  ;;  %v621_v36 = vpop.f32.mrb[9].mxu0 }
 0x1f4   : > { %v657_v37 = vmax.f32 %v653_v29, %v621_v36  ;;  %v1614_v38 = vpop.f32.mrb[10].mxu0 }
 0x1f5   : > { %v660_v39 = vmax.f32 %v656_v31, %v1614_v38  ;;  %v624_v40 = vpop.f32.mrb[11].mxu0 }
 0x1f6   : > { %v658_v41 = vmax.f32 %v654_v33, %v624_v40 }
 0x1fa   : > { %v1617_v42 = vpop.f32.mrb[12].mxu0 }
 0x1fb   : > { %v663_v43 = vmax.f32 %v659_v35, %v1617_v42  ;;  %v637_v44 = vpop.f32.mrb[13].mxu0 }
 0x1fc   : > { %v661_v45 = vmax.f32 %v657_v37, %v637_v44  ;;  %v1620_v46 = vpop.f32.mrb[14].mxu0 }
 0x1fd   : > { %v664_v47 = vmax.f32 %v660_v39, %v1620_v46  ;;  %v640_v48 = vpop.f32.mrb[15].mxu0 }
 0x1fe   : > { %v662_v49 = vmax.f32 %v658_v41, %v640_v48 }
 0x1ff   : > { %v666_v50 = vmax.f32 %v663_v43, %v664_v47 }
 0x200   : > { %v665_v51 = vmax.f32 %v661_v45, %v662_v49 }
 0x202   : > { %v667_v52 = vmax.f32 %v665_v51, %v666_v50 }
 0x204   : > { %v668_v53 = vrot.slane %v667_v52, 4 }
 0x206   : > { %v669_v54 = vmax.f32 %v667_v52, %v668_v53 }
 0x208   : > { %v670_v56 = vrot.slane %v669_v54, 2 }
 0x20a   : > { %v671_v57 = vmax.f32 %v669_v54, %v670_v56 }
 0x20c   : > { %v672_v59 = vrot.slane %v671_v57, 1 }
 0x20e   : > { %v673_v61 = vmax.f32 %v671_v57, %v672_v59 }
 0x210   : > { %v674_v63 = vmax.f32 %v652_v60, %v673_v61 }
 0x212   : > { %v682_v0 = vrot.slane %v674_v63, %v1623_v62  ;;  %816 = vst [vmem:[#allocation3] sm:$0x1] %v674_v63  ;;  %v675_v31 = vsub.f32 %v652_v60, %v674_v63 }
 0x214   : > { %v684_v1 = vsub.f32 %v589_v23, %v682_v0  ;;  %v685_v2 = vsub.f32 %v592_v25, %v682_v0  ;;  %v686_v3 = vsub.f32 %v1121_v22, %v682_v0  ;;  %v687_v4 = vsub.f32 %v1122_v24, %v682_v0 }
 0x215   : > { %v688_v5 = vsub.f32 %v605_v28, %v682_v0  ;;  %v689_v6 = vsub.f32 %v608_v32, %v682_v0  ;;  %v690_v7 = vsub.f32 %v1605_v26, %v682_v0  ;;  %v691_v8 = vsub.f32 %v1608_v30, %v682_v0 }
 0x216   : > { %v692_v9 = vsub.f32 %v621_v36, %v682_v0  ;;  %v693_v10 = vsub.f32 %v624_v40, %v682_v0  ;;  %v694_v11 = vsub.f32 %v1611_v34, %v682_v0  ;;  %v695_v12 = vsub.f32 %v1614_v38, %v682_v0 }
 0x217   : > { %v696_v13 = vsub.f32 %v637_v44, %v682_v0  ;;  %v697_v14 = vsub.f32 %v640_v48, %v682_v0  ;;  %v698_v15 = vsub.f32 %v1617_v42, %v682_v0  ;;  %v700_v16 = vmul.f32 1.442695, %v684_v1 }
 0x218   : > { %v702_v17 = vmul.f32 1.442695, %v685_v2  ;;  %v704_v18 = vmul.f32 1.442695, %v686_v3  ;;  %v706_v19 = vmul.f32 1.442695, %v687_v4  ;;  %v699_v20 = vsub.f32 %v1620_v46, %v682_v0 }
 0x219   : > { %1266 = vpow2.f32 %v700_v16  ;;  %v708_v22 = vmul.f32 1.442695, %v688_v5  ;;  %v710_v23 = vmul.f32 1.442695, %v689_v6  ;;  %v712_v24 = vmul.f32 1.442695, %v690_v7 }
 0x21a   : > { %1268 = vpow2.f32 %v702_v17  ;;  %v714_v25 = vmul.f32 1.442695, %v691_v8  ;;  %v716_v26 = vmul.f32 1.442695, %v692_v9  ;;  %v718_v27 = vmul.f32 1.442695, %v693_v10 }
 0x21b   : > { %1270 = vpow2.f32 %v704_v18  ;;  %v720_v28 = vmul.f32 1.442695, %v694_v11  ;;  %v722_v29 = vmul.f32 1.442695, %v695_v12  ;;  %v724_v30 = vmul.f32 1.442695, %v696_v13 }
 0x21c   : > { %1272 = vpow2.f32 %v706_v19  ;;  %v726_v32 = vmul.f32 1.442695, %v697_v14  ;;  %v728_v34 = vmul.f32 1.442695, %v698_v15  ;;  %v730_v36 = vmul.f32 1.442695, %v699_v20 }
 0x21d   : > { %1274 = vpow2.f32 %v708_v22  ;;  %v676_v40 = vmul.f32 1.442695, %v675_v31  ;;  %v765_v15 = vld [vmem:[%s372_s7] sm:$0x1]  ;;  %v732_v19 = vld [vmem:[#allocation4] sm:$0x1] }
 0x21e   : > { %1276 = vpow2.f32 %v710_v23 }
 0x21f   : > { %1278 = vpow2.f32 %v712_v24 }
 0x220   : > { %1280 = vpow2.f32 %v714_v25  ;;  %v757_v25 = vld [vmem:[#allocation5] sm:$0x3] }
 0x221   : > { %1282 = vpow2.f32 %v716_v26 }
 0x222   : > { %1284 = vpow2.f32 %v718_v27 }
 0x223   : > { %v1267_v33 = vpop.eup %1266  ;;  %1286 = vpow2.f32 %v720_v28 }
 0x224   : > { %v1269_v35 = vpop.eup %1268  ;;  %1288 = vpow2.f32 %v722_v29 }
 0x225   : > { %v1271_v37 = vpop.eup %1270  ;;  %1290 = vpow2.f32 %v724_v30  ;;  %v734_v38 = vadd.f32 %v1269_v35, %v1267_v33  ;;  %v766_v39 = vpack.c.bf16 %v1269_v35, %v1267_v33  ;;  %v832_v33 = vld [vmem:[%s1724_s6] sm:$0xf] (!%p1082_p4) }
 0x226   : > { %v1273_v41 = vpop.eup %1272  ;;  %1292 = vpow2.f32 %v726_v32  ;;  %v1421_v32 = vmov (!%p1082_p4), 0.0  }
 0x227   : > { %v1275_v42 = vpop.eup %1274  ;;  %1294 = vpow2.f32 %v728_v34  ;;  %v735_v43 = vadd.f32 %v1271_v37, %v734_v38  ;;  %1136 = vmatpush3.bf16.msra.mxu1 %v766_v39  ;;  %v767_v44 = vpack.c.bf16 %v1273_v41, %v1271_v37  ;;  %1155 = vmatprep.subr.mxu0 (!%p1082_p4), %v1421_v32  ;;  %v1423_v34 = vmov (!%p1082_p4), 0   ;;  %v831_v39 = vld [vmem:[%s1723_s5] sm:$0xf] (!%p1082_p4) }
 0x228   : > { %v1277_v45 = vpop.eup %1276  ;;  %1137 = vmatprep.subr.bf16.mxu1 %v1419_v21  ;;  %1296 = vpow2.f32 %v730_v36  ;;  %1157 = vmatprep.mubr.msk.f32.mxu0 (!%p1082_p4), %vm1422_vm6, %v1421_v32 }
 0x229   : > { %v1279_v46 = vpop.eup %1278  ;;  %v736_v47 = vadd.f32 %v1273_v41, %v735_v43  ;;  %v768_v48 = vpack.c.bf16 %v1277_v45, %v1275_v42  ;;  %1298 = vpow2.f32 %v676_v40  ;;  %1300 = vset.pattern.permute.xlu0 (!%p1082_p4), %v1423_v34 }
 0x22a   : > { %v1281_v49 = vpop.eup %1280  ;;  %835 = vperm.xlu0 (!%p1082_p4), %1300, %v832_v33  }
 0x22b   : > { %v1283_v50 = vpop.eup %1282  ;;  %v737_v51 = vadd.f32 %v1275_v42, %v736_v47  ;;  %1138 = vmatpush3.bf16.msra.mxu1 %v767_v44  ;;  %v769_v52 = vpack.c.bf16 %v1281_v49, %v1279_v46  ;;  %v915_v42 = vld [vmem:[%s1564_s9] sm:$0xf] (!%p1082_p4) }
 0x22c   : > { %v1285_v53 = vpop.eup %1284  ;;  %1139 = vmatprep.subr.bf16.mxu1 %v1419_v21 }
 0x22d   : > { %v1287_v54 = vpop.eup %1286  ;;  %v738_v55 = vadd.f32 %v1277_v45, %v737_v51  ;;  %v770_v56 = vpack.c.bf16 %v1285_v53, %v1283_v50 }
 0x22e   : > { %v1289_v57 = vpop.eup %1288 }
 0x22f   : > { %v1291_v58 = vpop.eup %1290  ;;  %v739_v59 = vadd.f32 %v1279_v46, %v738_v55  ;;  %1140 = vmatpush3.bf16.msra.mxu1 %v768_v48  ;;  %v771_v60 = vpack.c.bf16 %v1289_v57, %v1287_v54 }
 0x230   : > { %v1293_v61 = vpop.eup %1292  ;;  %1141 = vmatprep.subr.bf16.mxu1 %v1419_v21 }
 0x231   : > { %v1295_v63 = vpop.eup %1294  ;;  %v740_v0 = vadd.f32 %v1281_v49, %v739_v59  ;;  %v772_v1 = vpack.c.bf16 %v1293_v61, %v1291_v58 }
 0x232   : > { %v1297_v2 = vpop.eup %1296 }
 0x233   : > { %v1299_v3 = vpop.eup %1298  ;;  %v741_v4 = vadd.f32 %v1283_v50, %v740_v0  ;;  %1142 = vmatpush3.bf16.msra.mxu1 %v769_v52  ;;  %v773_v5 = vpack.c.bf16 %v1297_v2, %v1295_v63 }
 0x234   : > { %1143 = vmatprep.subr.bf16.mxu1 %v1419_v21  ;;  %v762_v6 = vrot.slane %v1299_v3, %v1623_v62  ;;  %v733_v23 = vmul.f32 %v1299_v3, %v732_v19 }
 0x235   : > { %v742_v7 = vadd.f32 %v1285_v53, %v741_v4 }
 0x237   : > { %v743_v8 = vadd.f32 %v1287_v54, %v742_v7  ;;  %1144 = vmatpush3.bf16.msra.mxu1 %v770_v56 }
 0x238   : > { %1145 = vmatprep.subr.bf16.mxu1 %v1419_v21 }
 0x239   : > { %v744_v9 = vadd.f32 %v1289_v57, %v743_v8 }
 0x23b   : > { %v745_v10 = vadd.f32 %v1291_v58, %v744_v9  ;;  %1146 = vmatpush3.bf16.msra.mxu1 %v771_v60 }
 0x23c   : > { %1147 = vmatprep.subr.bf16.mxu1 %v1419_v21 }
 0x23d   : > { %v746_v11 = vadd.f32 %v1293_v61, %v745_v10 }
 0x23f   : > { %v747_v12 = vadd.f32 %v1295_v63, %v746_v11  ;;  %1148 = vmatpush3.bf16.msra.mxu1 %v772_v1 }
 0x240   : > { %1149 = vmatprep.subr.bf16.mxu1 %v1419_v21  ;;  %v764_v21 = vmul.f32 %v762_v6, %v757_v25 }
 0x241   : > { %v748_v13 = vadd.f32 %v1297_v2, %v747_v12 }
 0x243   : > { %v749_v14 = vrot.slane %v748_v13, 4  ;;  %1150 = vmatpush3.bf16.msra.mxu1 %v773_v5 }
 0x245   : > { %v750_v16 = vadd.f32 %v749_v14, %v748_v13 }
 0x246   : > { %1152 = vmatmul.mubr.bf16.vlgmr.msra.gmra.mrb[0].mxu1 %v765_v15 }
 0x247   : > { %v751_v17 = vrot.slane %v750_v16, 2 }
 0x249   : > { %v752_v18 = vadd.f32 %v751_v17, %v750_v16 }
 0x24b   : > { %v753_v20 = vrot.slane %v752_v18, 1 }
 0x24d   : > { %v754_v22 = vadd.f32 %v753_v20, %v752_v18 }
 0x24f   : > { %v755_v24 = vadd.f32 %v754_v22, %v733_v23 }
 0x251   : > { %756 = vst [vmem:[#allocation4] sm:$0x1] %v755_v24 }
 0x258   : > { %v822_v31 = vld [vmem:[#allocation4] sm:$0x1] (!%p1082_p4) }
 0x259   : > { %1301 = vrcp.f32 (!%p1082_p4), %v822_v31 }
 0x263   : > { %v1302_v35 = vpop.eup (!%p1082_p4), %1301 }
 0x264   : > { %v828_v37 = vrot.slane (!%p1082_p4), %v1302_v35, %v1623_v62 }
 0x2a9   : > { %v836_v40 = vpop.permute.xlu0 (!%p1082_p4), %835 }
 0x316   : > { %820 = sbr.rel (%p1082_p4) target bundleno = 1024 (0x400), region = 56 }
 0x319   : > { %v808_v26 = vpop.f32.mrb[0].mxu1 }
 0x31a   : > { %v814_v27 = vadd.f32 %v808_v26, %v764_v21  ;;  %v1153_v28 = vpop.f32.mrb[1].mxu1 }
 0x31b   : > { %v811_v29 = vpop.f32.mrb[2].mxu1 }
 0x31c   : > { %815 = vst [vmem:[#allocation5] sm:$0x3] %v814_v27  ;;  %v1154_v30 = vpop.f32.mrb[3].mxu1 }
 0x323   : > { %v821_v36 = vld [vmem:[#allocation5] sm:$0x3] }
 0x324   : > { %v830_v38 = vmul.f32 %v828_v37, %v821_v36 }
 0x326   : > { %1156 = vmatpush3.msk.msra.mxu0 %vm841_vm7, %v830_v38 }
 0x327   : > { %1158 = vmatmul.mubr.msk.f32.vlgmr.msra.gmra.mrb[0].mxu0 %vm526_vm4, %v831_v39 }
 0x3fa   : > { %v911_v41 = vpop.f32.mrb[0].mxu0 }
 0x3fb   : > { %v912_v43 = vadd.f32 %v911_v41, %v836_v40  ;;  %v1159_v44 = vpop.f32.mrb[1].mxu0 }
 0x3fd   : > { %v916_v45 = vadd.f32 %v915_v42, %v912_v43 }
 0x3ff   : > { %917 = vst [vmem:[%s347_s13] sm:$0xf] %v916_v45 }
 0x400 PF: > { %s1086_s22 = sshll.u32 %s1397_s29, 1  ;;  %s934_s12 = sshll.u32 %s347_s13, 4  ;;  %s1661_s12 = int_to_ptr.vmem [resolvable:$true] %s934_s12 }
 0x401   : > { %s930_s23 = sadd.s32 %s1393_s28, %s1086_s22  ;;  %s1752_s19 = sld [smem:[#allocation20_spill]] }
 0x402   : > { %s1087_s18 = sshll.u32 %s930_s23, 6  ;;  %s1753_s24 = sand.u32 1, %s1381_s25  }
 0x403   : > { %s919_s30 = scalar_lea.sflag [#allocation7], %s1753_s24  ;;  %s1303_s8 = scalar_lea.vmem %s1661_s12, 64 }
 0x404   : > { %p1304_p5 = scmp.ne.s32.totalorder %s1661_s12, %s1303_s8  ;;  %s1424_s28 = smov [#allocation6]  }
 0x405   : > { %s1307_s29 = sshll.u32 %s1424_s28, 4  ;;  %s1308_s29 = int_to_ptr.vmem [resolvable:$false] %s1307_s29 }
 0x406   : > { %p1305_p8 = pnand %p1304_p5, %p1527_p6  ;;  %s1309_s11 = scalar_lea.vmem %s1308_s29, 128 }
 0x407   : > { %s932_s21 = scalar_lea.hbm %s1752_s19, %s1087_s18  ;;  %p1310_p10 = scmp.lt.s32.totalorder %s1661_s12, %s1308_s29 }
 0x408   : > { %p1306_p9 = pneg %p1305_p8  ;;  %p1311_p11 = scmp.lt.s32.totalorder %s1309_s11, %s1303_s8 }
 0x40a   : > { %p1312_p12 = por %p1311_p11, %p1310_p10 }
 0x40c   : > { %p1313_p13 = pnand %p1312_p12, %p1306_p9 }
 0x40e   : > { %1316 = shalt.err (!%p1313_p13)
}
 0x40f   : > { %s1317_s13 = scalar_lea.hbm %s932_s21, 64  ;;  %s1321_s15 = scalar_lea.hbm %s1752_s19, 256 }
 0x410   : > { %p1318_p0 = scmp.ne.s32.totalorder %s932_s21, %s1317_s13  ;;  %p1322_p3 = scmp.lt.u32.totalorder %s932_s21, %s1752_s19 }
 0x411   : > { %p1323_p4 = scmp.lt.u32.totalorder %s1321_s15, %s1317_s13  ;;  %p1325_p8 = scmp.lt.u32.totalorder %s1317_s13, %s932_s21 }
 0x412   : > { %p1319_p1 = pnand %p1318_p0, %p1527_p6 }
 0x413   : > { %p1324_p5 = por %p1323_p4, %p1322_p3 }
 0x414   : > { %p1320_p2 = pneg %p1319_p1 }
 0x415   : > { %p1326_p10 = por %p1325_p8, %p1324_p5 }
 0x417   : > { %p1327_p9 = pnand %p1326_p10, %p1320_p2 }
 0x419   : > { %1330 = shalt.err (!%p1327_p9)
}
 0x41a   : > { %1161 = dma.vmem_to_hbm [thread:$0]  (%p1527_p6), %s1661_s12, 64, %s932_s21, %s919_s30  }
 0x41b PF: > { %s1754_s27 = sld [smem:[#allocation14_spill]]  ;;  %s1755_s17 = sld [smem:[#allocation9_spill]] }
 0x421   : > { %p1167_p11 = scmp.ge.s32.totalorder %s1754_s27, 2  ;;  %s946_s23 = sand.u32 1, %s1755_s17  }
 0x422   : > { %s947_s18 = scalar_lea.sflag [#allocation7], %s946_s23 }
 0x423   : > { %p1164_p12 = pnand %p1167_p11, %p1534_p7 }
 0x425   : > { %1372 = dma.done.wait (!%p1164_p12), %s947_s18, 64  }
 0x426   : > { %1374 = vsyncadd (!%p1164_p12), %s947_s18, 4294967232  ;;  %s20_s10 = sadd.s32 1, %s1754_s27   ;;  %s1757_s20 = sld [smem:[#allocation10_spill]] }
 0x427   : > { %p17_p13 = scmp.ge.s32.totalorder %s20_s10, 10   ;;  %s1758_s26 = sld [smem:[#allocation19_spill]] }
 0x428   : > { %s1759_s27 = sld [smem:[#allocation11_spill]]  ;;  %s1760_s28 = sld [smem:[#allocation12_spill]] }
 0x429   : > { %s1761_s29 = sld [smem:[#allocation13_spill]]  ;;  %s1762_s30 = sld [smem:[#allocation15_spill]] }
 0x42a   : > { %s1763_s8 = sld [smem:[#allocation16_spill]]  ;;  %s1764_s9 = sld [smem:[#allocation18_spill]] }
 0x42b   : > { %s1765_s24 = smov %s1381_s25  ;;  %19 = sbr.rel (!%p17_p13) target bundleno = 8 (0x8), region = 97 }
 0x42c   : > { %s1766_s25 = smov %s1757_s20 }
 0x432   :  { %952 = vsyncpa [#allocation7], 1 }
 0x433   :  { %954 = vsyncpa [#allocation7 + $0x1], 1 }

</bundles_post_ra>
